<compile_context>
chip_gen: v7x
topology: tpu7x:2x2x1
jax: 0.10.0
libtpu: 0.0.40
codegen_flags: <defaults>
</compile_context>

<pallas_src>
import jax
import jax.numpy as jnp
from jax.experimental import pallas as pl
from jax.experimental.pallas import tpu as pltpu


# ------------------------------ Pallas kernel ------------------------------

def fpn_block_kernel(x_ref, skip_ref, w_ref, b_ref, o_ref):
    # x_ref   : (ROWS_IN, w, P)        low-res pyramid rows for this tile
    # skip_ref: (TILE_M, Cs)           skip rows (flattened H*W) for this tile
    # w_ref   : (Cs, P)                1x1 conv weight (Cin, Cout)
    # b_ref   : (1, P)                 1x1 conv bias (f32)
    # o_ref   : (ROWS_IN, 2, W, P)     output, row-pair structured
    rows_in, w_in, P = x_ref.shape
    W = 2 * w_in

    # 1x1 conv on the skip tile: a single MXU matmul with f32 accumulation.
    sc = jnp.dot(skip_ref[...], w_ref[...],
                 preferred_element_type=jnp.float32)          # (TILE_M, P) f32
    sc = sc + b_ref[...]

    # Row-pair view of the conv result; layout no-op (last dims (W, P) kept,
    # W % 8 == 0 so (8,128) tiles stay within one row plane).
    sc = sc.reshape(rows_in, 2, W, P)

    # Nearest x2 upsample fused into the add: only the width-doubled x (half
    # the output size, still bf16) is materialized; the row doubling is a
    # broadcast over the size-2 leading axis.
    up_w = jnp.repeat(x_ref[...], 2, axis=1)                  # (ROWS_IN, W, P)
    o_ref[...] = (sc + up_w[:, None, :, :]).astype(o_ref.dtype)


# --------------------------------- wrapper ----------------------------------

def _pick_rows_out_tile(total_rows_out, W, target_tile_m):
    """Largest even divisor r of total_rows_out with r*W <= target_tile_m."""
    best = 2
    for r in range(2, total_rows_out + 1, 2):
        if total_rows_out % r == 0 and r * W <= target_tile_m:
            best = r
    return best


def fpn_block(x, skip, w, b, *, tile_rows_out=None, target_tile_m=1024,
              out_dtype=None):
    """FPNBlock forward.

    x    : (N, h, w, P)      NHWC pyramid feature (upsampled x2), bf16/f32
    skip : (N, 2h, 2w, Cs)   NHWC skip feature, bf16/f32
    w    : (Cs, P)           1x1 conv weight (Conv2d weight as (Cin, Cout))
    b    : (P,)              1x1 conv bias (kept f32)
    returns (N, 2h, 2w, P) in `out_dtype` (default: x.dtype)
    """
    N, h, wx, P = x.shape
    Ns, H, W, Cs = skip.shape
    assert Ns == N and (H, W) == (2 * h, 2 * wx), (x.shape, skip.shape)
    assert w.shape == (Cs, P) and b.shape == (P,), (w.shape, b.shape)
    # TODO(synk): pad W to a multiple of 8 for odd widths (e.g. 300-wide FPN
    # levels); the in-kernel row-pair reshape requires W % 8 == 0.
    assert W % 8 == 0, f"upsampled width {W} must be a multiple of 8"

    out_dtype = x.dtype if out_dtype is None else out_dtype

    total_rows_in = N * h          # batch folded into the row axis
    total_rows_out = N * H

    if tile_rows_out is None:
        tile_rows_out = _pick_rows_out_tile(total_rows_out, W, target_tile_m)
    assert tile_rows_out % 2 == 0 and total_rows_out % tile_rows_out == 0, \
        (tile_rows_out, total_rows_out)
    rows_in_tile = tile_rows_out // 2
    tile_m = tile_rows_out * W
    num_tiles = total_rows_out // tile_rows_out

    x2 = x.reshape(total_rows_in, wx, P)
    skip2 = skip.reshape(N * H * W, Cs)
    b2 = b.reshape(1, P).astype(jnp.float32)

    itemsize = lambda a: jnp.dtype(a.dtype).itemsize
    out_isz = jnp.dtype(out_dtype).itemsize

    # Per-step footprint (double-buffered I/O blocks + resident weight/bias).
    block_bytes = (2 * rows_in_tile * wx * P * itemsize(x)
                   + 2 * tile_m * Cs * itemsize(skip)
                   + 2 * tile_m * P * out_isz
                   + Cs * P * itemsize(w) + P * 4)
    vmem_limit = int(min(max(4 * block_bytes, 32 << 20), 64 << 20))

    flops = 2 * (N * H * W) * Cs * P + 2 * (N * H * W) * P
    bytes_accessed = (x.size * itemsize(x) + skip.size * itemsize(skip)
                      + w.size * itemsize(w) + b.size * 4
                      + N * H * W * P * out_isz)

    out = pl.pallas_call(
        fpn_block_kernel,
        out_shape=jax.ShapeDtypeStruct((total_rows_in, 2, W, P), out_dtype),
        grid=(num_tiles,),
        in_specs=[
            pl.BlockSpec((rows_in_tile, wx, P), lambda i: (i, 0, 0)),
            pl.BlockSpec((tile_m, Cs), lambda i: (i, 0)),
            pl.BlockSpec((Cs, P), lambda i: (0, 0)),   # weight stays resident
            pl.BlockSpec((1, P), lambda i: (0, 0)),    # bias stays resident
        ],
        out_specs=pl.BlockSpec((rows_in_tile, 2, W, P), lambda i: (i, 0, 0, 0)),
        compiler_params=pltpu.CompilerParams(
            dimension_semantics=("parallel",),         # v7x: tiles over 2 TCs
            vmem_limit_bytes=vmem_limit),
        cost_estimate=pl.CostEstimate(flops=flops, transcendentals=0,
                                      bytes_accessed=bytes_accessed),
    )(x2, skip2, w, b2)
    return out.reshape(N, H, W, P)


# --------------------------- pure-JAX reference -----------------------------

def fpn_block_ref(x, skip, w, b):
    up = jnp.repeat(jnp.repeat(x, 2, axis=1), 2, axis=2)
    sc = jnp.einsum('nhwc,cp->nhwp', skip, w) + b
    return up + sc


# ----------------------------------- main ------------------------------------

if __name__ == "__main__":
    key = jax.random.PRNGKey(0)
    k1, k2, k3, k4 = jax.random.split(key, 4)

    N = 2
    pyramid_channels = 128      # lane-dense trailing dim
    skip_channels = 64
    h, w_sp = 8, 8              # low-res pyramid level; skip is 16x16

    x_f32 = jax.random.normal(k1, (N, h, w_sp, pyramid_channels), jnp.float32)
    skip_f32 = jax.random.normal(k2, (N, 2 * h, 2 * w_sp, skip_channels),
                                 jnp.float32)
    w_f32 = 0.1 * jax.random.normal(k3, (skip_channels, pyramid_channels),
                                    jnp.float32)
    b_f32 = 0.1 * jax.random.normal(k4, (pyramid_channels,), jnp.float32)

    # bf16 operands (halves HBM traffic on this bandwidth-bound kernel);
    # MXU accumulation stays f32 inside the kernel.
    x_bf = x_f32.astype(jnp.bfloat16)
    skip_bf = skip_f32.astype(jnp.bfloat16)
    w_bf = w_f32.astype(jnp.bfloat16)

    # tile_rows_out=8 -> 4 grid steps at this toy size (exercises pipelining
    # and gives each v7x TensorCore 2 tiles); at real FPN sizes the default
    # picker targets ~1024-row tiles.
    out = fpn_block(x_bf, skip_bf, w_bf, b_f32, tile_rows_out=8)
    out = jax.block_until_ready(out)

    assert out.shape == (N, 2 * h, 2 * w_sp, pyramid_channels), out.shape
    assert out.dtype == jnp.bfloat16, out.dtype

    ref = fpn_block_ref(x_bf.astype(jnp.float32), skip_bf.astype(jnp.float32),
                        w_bf.astype(jnp.float32), b_f32)
    out_f32 = out.astype(jnp.float32)
    assert bool(jnp.all(jnp.isfinite(out_f32)))
    max_err = float(jnp.max(jnp.abs(out_f32 - ref)))
    assert max_err < 5e-2, max_err
    print("KERNEL_OK")
</pallas_src>

<mosaic_0001>
module attributes {stable_mosaic.version = 11 : i64} {
  func.func @fpn_block_kernel(%arg0: i32, %arg1: memref<4x8x128xbf16, #tpu.memory_space<vmem>>, %arg2: memref<128x64xbf16, #tpu.memory_space<vmem>>, %arg3: memref<64x128xbf16, #tpu.memory_space<vmem>>, %arg4: memref<1x128xf32, #tpu.memory_space<vmem>>, %arg5: memref<4x2x16x128xbf16, #tpu.memory_space<vmem>>) attributes {dimension_semantics = [#tpu.dimension_semantics<parallel>], iteration_bounds = array<i64: 4>, scalar_prefetch = 0 : i64, scratch_operands = 0 : i64, tpu.core_type = #tpu.core_type<tc>, window_params = [{transform_indices = @transform_0, window_bounds = array<i64: 4, 8, 128>}, {transform_indices = @transform_1, window_bounds = array<i64: 128, 64>}, {pipeline_mode = #tpu.pipeline_mode<synchronous>, transform_indices = @transform_2, window_bounds = array<i64: 64, 128>}, {pipeline_mode = #tpu.pipeline_mode<synchronous>, transform_indices = @transform_3, window_bounds = array<i64: 1, 128>}, {transform_indices = @transform_4, window_bounds = array<i64: 4, 2, 16, 128>}]} {
    %c0 = arith.constant 0 : index
    %c0_0 = arith.constant 0 : index
    %0 = vector.load %arg2[%c0, %c0_0] : memref<128x64xbf16, #tpu.memory_space<vmem>>, vector<128x64xbf16>
    %c0_1 = arith.constant 0 : index
    %c0_2 = arith.constant 0 : index
    %1 = vector.load %arg3[%c0_1, %c0_2] : memref<64x128xbf16, #tpu.memory_space<vmem>>, vector<64x128xbf16>
    %cst = arith.constant dense<0.000000e+00> : vector<128x128xf32>
    %2 = tpu.matmul %0, %1, %cst {dimension_numbers = #tpu.dot_dimension_numbers<[1], [0], [0], [1], [0, 0, 1, 1], [], []>} : vector<128x64xbf16>, vector<64x128xbf16>, vector<128x128xf32> -> vector<128x128xf32>
    %c0_3 = arith.constant 0 : index
    %c0_4 = arith.constant 0 : index
    %3 = vector.load %arg4[%c0_3, %c0_4] : memref<1x128xf32, #tpu.memory_space<vmem>>, vector<1x128xf32>
    %4 = vector.broadcast %3 : vector<1x128xf32> to vector<128x128xf32>
    %5 = arith.addf %2, %4 : vector<128x128xf32>
    %6 = vector.shape_cast %5 : vector<128x128xf32> to vector<4x2x16x128xf32>
    %c0_5 = arith.constant 0 : index
    %c0_6 = arith.constant 0 : index
    %c0_7 = arith.constant 0 : index
    %7 = vector.load %arg1[%c0_5, %c0_6, %c0_7] : memref<4x8x128xbf16, #tpu.memory_space<vmem>>, vector<4x8x128xbf16>
    %8 = vector.shape_cast %7 : vector<4x8x128xbf16> to vector<4x8x1x128xbf16>
    %9 = vector.broadcast %8 : vector<4x8x1x128xbf16> to vector<4x8x2x128xbf16>
    %10 = vector.shape_cast %9 : vector<4x8x2x128xbf16> to vector<4x16x128xbf16>
    %11 = vector.shape_cast %10 : vector<4x16x128xbf16> to vector<4x1x16x128xbf16>
    %12 = arith.extf %11 : vector<4x1x16x128xbf16> to vector<4x1x16x128xf32>
    %13 = vector.broadcast %12 : vector<4x1x16x128xf32> to vector<4x2x16x128xf32>
    %14 = arith.addf %6, %13 : vector<4x2x16x128xf32>
    %15 = arith.truncf %14 : vector<4x2x16x128xf32> to vector<4x2x16x128xbf16>
    %c0_8 = arith.constant 0 : index
    %c0_9 = arith.constant 0 : index
    %c0_10 = arith.constant 0 : index
    %c0_11 = arith.constant 0 : index
    %16 = vector.load %arg5[%c0_8, %c0_9, %c0_10, %c0_11] : memref<4x2x16x128xbf16, #tpu.memory_space<vmem>>, vector<4x2x16x128xbf16>
    tpu.vector_store %arg5[%c0_8, %c0_9, %c0_10, %c0_11], %15 {strides = array<i32>} : memref<4x2x16x128xbf16, #tpu.memory_space<vmem>>, vector<4x2x16x128xbf16>,
    return
  }
  func.func @transform_0(%arg0: i32) -> (i32, i32, i32) {
    %c0_i32 = arith.constant 0 : i32
    %c0_i32_0 = arith.constant 0 : i32
    %c0_i32_1 = arith.constant 0 : i32
    return %arg0, %c0_i32, %c0_i32_0 : i32, i32, i32
  }
  func.func @transform_1(%arg0: i32) -> (i32, i32) {
    %c0_i32 = arith.constant 0 : i32
    %c0_i32_0 = arith.constant 0 : i32
    return %arg0, %c0_i32 : i32, i32
  }
  func.func @transform_2(%arg0: i32) -> (i32, i32) {
    %c0_i32 = arith.constant 0 : i32
    %c0_i32_0 = arith.constant 0 : i32
    %c0_i32_1 = arith.constant 0 : i32
    return %c0_i32, %c0_i32_0 : i32, i32
  }
  func.func @transform_3(%arg0: i32) -> (i32, i32) {
    %c0_i32 = arith.constant 0 : i32
    %c0_i32_0 = arith.constant 0 : i32
    %c0_i32_1 = arith.constant 0 : i32
    return %c0_i32, %c0_i32_0 : i32, i32
  }
  func.func @transform_4(%arg0: i32) -> (i32, i32, i32, i32) {
    %c0_i32 = arith.constant 0 : i32
    %c0_i32_0 = arith.constant 0 : i32
    %c0_i32_1 = arith.constant 0 : i32
    %c0_i32_2 = arith.constant 0 : i32
    return %arg0, %c0_i32, %c0_i32_0, %c0_i32_1 : i32, i32, i32, i32
  }
}

</mosaic_0001>

<bundles_post_ra>
// kernel: tpu_custom_call.1
= control target key start
LH: loop header
LB: loop body
LE: loop exit
PB: predicated region body
PF: predicated region fallthrough
CT: control target
= control target key end

     0   :  { %9 = vsyncpa [#allocation3], 0  ;;  %s1994_s0 = inlined_call_operand.vmem [shape: bf16[16,8,128], index: 0, kind: input, shape index: {}]   ;;  %s1995_s1 = inlined_call_operand.vmem [shape: bf16[512,64], index: 1, kind: input, shape index: {}]   ;;  %s1996_s2 = inlined_call_operand.vmem [shape: bf16[64,128], index: 2, kind: input, shape index: {}]   ;;  %s1997_s3 = inlined_call_operand.vmem [shape: f32[1,128], index: 3, kind: input, shape index: {}]   ;;  %s1998_s4 = inlined_call_operand.hbm [shape: bf16[16,2,16,128], index: 4, kind: output, shape index: {}]  }
   0x1   :  { %11 = vsyncpa [#allocation3 + $0x1], 0  ;;  %s1682_s15 = smov 0   ;;  %s1684_s16 = smov 0  }
   0x2   :  { %s1686_s17 = smov 0   ;;  %s1688_s18 = smov 0  }
   0x3 LB: > { %s1703_s19 = sadd.s32 4294967295, %s1650_s18   ;;  %s1352_s20 = sadd.s32 4294967294, %s1650_s18   ;;  %s1650_s18 = sphi %s1688_s18, %s2004_s18   ;;  %s1646_s17 = sphi %s1686_s17, %s2003_s17   ;;  %s1642_s16 = sphi %s1684_s16, %s2002_s16   ;;  %s1638_s15 = sphi %s1682_s15, %s2001_s15  }
   0x4   : > { %s1707_s21 = sadd.s32 1, %s1650_s18   ;;  %s118_s22 = sadd.s32 1, %s1646_s17 }
   0x5   : > { %s115_s23 = ssub.s32 %s1650_s18, %s1707_s21  ;;  %p128_p0 = scmp.ne.s32.totalorder %s1646_s17, %s1642_s16 }
   0x6   : > { %p116_p1 = scmp.eq.s32.totalorder %s115_s23, 0  ;;  %p129_p2 = scmp.eq.s32.totalorder %s1703_s19, 3 }
   0x7   : > { %p134_p3 = scmp.ne.s32.totalorder %s1642_s16, %s1638_s15  ;;  %p135_p4 = scmp.eq.s32.totalorder %s1352_s20, 3 }
   0x8   : > { %s1718_s24 = scalar_select %p116_p1, %s1646_s17, %s118_s22  }
   0x9   : > { %p1720_p5 = por %p129_p2, %p128_p0  ;;  %p1724_p6 = por %p135_p4, %p134_p3 }
   0xa   : > { %p1355_p7 = scmp.ge.s32.totalorder %s1650_s18, 1  ;;  %p177_p8 = scmp.lt.s32.totalorder %s1650_s18, 5 }
   0xc   : > { %p178_p9 = pnand %p1355_p7, %p177_p8 }
   0xd   : > { %v1576_v0 = vld [vmem:[%s1996_s2] sm:$0xff] (!%p178_p9)   ;;  %s1359_s29 = sshll.u32 (!%p178_p9), %s1703_s19, 4  ;;  %v1577_v1 = vld [vmem:[%s1996_s2 + $0x8] sm:$0xff] (!%p178_p9)   ;;  %v1578_v2 = vld [vmem:[%s1996_s2 + $0x10] sm:$0xff] (!%p178_p9)   ;;  %vm317_vm0 = vcmask (!%p178_p9), 523264   ;;  %s1357_s14 = sshll.u32 (!%p178_p9), %s1703_s19, 2  ;;  %v458_v14 = vlaneseq (!%p178_p9) }
   0xe   : > { %181 = sbr.rel (%p178_p9) target bundleno = 274 (0x112), region = 36  ;;  %p215_p10 = scmp.lt.s32.totalorder (!%p178_p9), %s1359_s29, 63  ;;  %1501 = vmatprep.subr.bf16.mxu0 (!%p178_p9), %v1576_v0  ;;  %1525 = vmatprep.subr.bf16.mxu1 (!%p178_p9), %v1576_v0  ;;  %v1579_v3 = vld [vmem:[%s1996_s2 + $0x18] sm:$0xff] (!%p178_p9)   ;;  %v1652_v12 = vmov (!%p178_p9), 1966171168  }
   0xf   : > { %1502 = vmatpush3.bf16.msra.mxu0 (!%p178_p9), %v1576_v0  ;;  %1529 = vmatpush3.bf16.msra.mxu1 (!%p178_p9), %v1576_v0  ;;  %p209_p11 = scmp.lt.s32.totalorder (!%p178_p9), %s1357_s14, 15  ;;  %v456_v13 = vunpack.c.l.s4 (!%p178_p9), %v1652_v12  ;;  %v1760_v16 = vshrl.u32 (!%p178_p9), %v458_v14, 7  ;;  %s205_s30 = sand.u32 (!%p178_p9), 1, %s1642_s16  }
  0x10   : > { %1503 = vmatprep.subr.bf16.mxu0 (!%p178_p9), %v1577_v1  ;;  %1526 = vmatprep.subr.bf16.mxu1 (!%p178_p9), %v1577_v1  ;;  %s1356_s5 = sshll.u32 (!%p178_p9), %s205_s30, 6  ;;  %s1441_s7 = sshll.u32 (!%p178_p9), %s1703_s19, 10 }
  0x11   : > { %v457_v15 = vunpack.c.0.s8 (!%p178_p9), %v456_v13  ;;  %v1772_v30 = vsub.s32 (!%p178_p9), 0, %v1760_v16  ;;  %s1924_s6 = scalar_lea.vmem (!%p178_p9), [#allocation2], %s1356_s5  ;;  %s1943_s19 = scalar_lea.hbm (!%p178_p9), %s1998_s4, %s1441_s7 }
  0x12   : > { %s1953_s11 = scalar_lea.sflag (!%p178_p9), [#allocation3], %s205_s30 }
  0x13   : > { %1504 = vmatpush3.bf16.msra.mxu0 (!%p178_p9), %v1577_v1  ;;  %1530 = vmatpush3.bf16.msra.mxu1 (!%p178_p9), %v1577_v1  ;;  %v1764_v18 = vsub.s32 (!%p178_p9), %v457_v15, %v1760_v16 }
  0x14   : > { %1505 = vmatprep.subr.bf16.mxu0 (!%p178_p9), %v1578_v2  ;;  %1527 = vmatprep.subr.bf16.mxu1 (!%p178_p9), %v1578_v2 }
  0x15   : > { %s2006_s29 = smov (!%p215_p10, %s1359_s29), 63  ;;  %s2008_s14 = smov (!%p209_p11, %s1357_s14), 15 }
  0x16   : > { %s1360_s8 = sshll.u32 %s2006_s29, 2  ;;  %s1358_s20 = sshll.u32 %s2008_s14, 2 }
  0x17   : > { %s218_s13 = scalar_lea.vmem %s1995_s1, %s1360_s8  ;;  %1506 = vmatpush3.bf16.msra.mxu0 %v1578_v2  ;;  %1531 = vmatpush3.bf16.msra.mxu1 %v1578_v2  ;;  %s1758_s27 = scalar_lea.vmem %s1994_s0, %s1358_s20 }
  0x18   : > { %v1580_v4 = vld [vmem:[%s218_s13] sm:$0xff]   ;;  %1507 = vmatprep.subr.bf16.mxu0 %v1579_v3  ;;  %1528 = vmatprep.subr.bf16.mxu1 %v1579_v3  ;;  %v1582_v6 = vld [vmem:[%s218_s13 + $0x8] sm:$0xff]   ;;  %v1584_v8 = vld [vmem:[%s218_s13 + $0x10] sm:$0xff]   ;;  %s1278_s8 = sshll.u32 %s1924_s6, 4  ;;  %s1945_s8 = int_to_ptr.vmem [resolvable:$true] %s1278_s8 }
  0x19   : > { %v1581_v5 = vld [vmem:[%s218_s13 + $0x20] sm:$0xff]   ;;  %1509 = vmatprep.mubr.msk.bf16.mxu0 %vm317_vm0, %v1580_v4  ;;  %v1583_v7 = vld [vmem:[%s218_s13 + $0x28] sm:$0xff]   ;;  %v1585_v9 = vld [vmem:[%s218_s13 + $0x30] sm:$0xff]   ;;  %s1588_s12 = scalar_lea.vmem %s1945_s8, 1024 }
  0x1a   : > { %1517 = vmatprep.mubr.msk.bf16.mxu1 %vm317_vm0, %v1581_v5  ;;  %v1586_v10 = vld [vmem:[%s218_s13 + $0x18] sm:$0xff]   ;;  %v1382_v17 = vld.sshfl [vmem:[%s1758_s27] sm:$0x33 pattern:$0x75316420]  ;;  %p1589_p12 = scmp.ne.s32.totalorder %s1945_s8, %s1588_s12 }
  0x1b   : > { %1508 = vmatpush3.bf16.msra.mxu0 %v1579_v3  ;;  %1532 = vmatpush3.bf16.msra.mxu1 %v1579_v3  ;;  %v1587_v11 = vld [vmem:[%s218_s13 + $0x38] sm:$0xff]   ;;  %v454_v19 = vcombine.high %v1382_v17, %v1382_v17  ;;  %v1384_v20 = vld.sshfl [vmem:[%s1758_s27 + $0x8] sm:$0x33 pattern:$0x75316420]  ;;  %v461_v21 = vrot.slane %v1382_v17, %v1764_v18  ;;  %s1654_s13 = smov [#allocation2]  }
  0x1c   : > { %v502_v23 = vcombine.high %v1384_v20, %v1384_v20  ;;  %v509_v24 = vrot.slane %v1384_v20, %v1764_v18  ;;  %p1590_p13 = pnand %p1589_p12, %p1720_p5  ;;  %s1592_s14 = sshll.u32 %s1654_s13, 4  ;;  %s1593_s14 = int_to_ptr.vmem [resolvable:$false] %s1592_s14 }
  0x1d   : > { %v468_v22 = vrot.slane %v454_v19, %v1764_v18  ;;  %v544_v25 = vunpack.i.h.s16 %v461_v21  ;;  %v1386_v29 = vpack.i.b16 %v461_v21, %v461_v21  ;;  %v469_v31 = vcombine.high %v461_v21, %v461_v21  ;;  %s1594_s20 = scalar_lea.vmem %s1593_s14, 2048  ;;  %p1595_p1 = scmp.lt.s32.totalorder %s1945_s8, %s1593_s14 }
  0x1e   : > { %1510 = vmatmul.mubr.msk.bf16.vlgmr.msra.gmra.mrb[0].mxu0 %vm317_vm0, %v1582_v6  ;;  %1518 = vmatmul.mubr.msk.bf16.vlgmr.msra.gmra.mrb[0].mxu1 %vm317_vm0, %v1583_v7  ;;  %v516_v27 = vrot.slane %v502_v23, %v1764_v18  ;;  %v560_v28 = vunpack.i.h.s16 %v509_v24  ;;  %v1394_v37 = vpack.i.b16 %v509_v24, %v509_v24  ;;  %v517_v47 = vcombine.high %v509_v24, %v509_v24  ;;  %p1591_p0 = pneg %p1590_p13  ;;  %p1596_p2 = scmp.lt.s32.totalorder %s1594_s20, %s1588_s12 }
  0x1f   : > { %1513 = vmatprep.mubr.msk.bf16.mxu0 %vm317_vm0, %v1584_v8  ;;  %1521 = vmatprep.mubr.msk.bf16.mxu1 %vm317_vm0, %v1585_v9  ;;  %v546_v26 = vunpack.i.h.s16 %v468_v22  ;;  %v576_v32 = vpack.i.b16 %v544_v25, %v544_v25  ;;  %v1387_v33 = vpack.i.b16 %v468_v22, %v468_v22  ;;  %v470_v34 = vcombine.high %v468_v22, %v468_v22 }
  0x20   : > { %v562_v36 = vunpack.i.h.s16 %v516_v27  ;;  %v592_v38 = vpack.i.b16 %v560_v28, %v560_v28  ;;  %v610_v39 = vrot.slane %v1386_v29, %v1772_v30  ;;  %v1395_v40 = vpack.i.b16 %v516_v27, %v516_v27  ;;  %p1597_p3 = por %p1596_p2, %p1595_p1 }
  0x21   : > { %v578_v35 = vpack.i.b16 %v546_v26, %v546_v26  ;;  %v548_v41 = vunpack.i.h.s16 %v469_v31  ;;  %v614_v42 = vrot.slane %v576_v32, %v1772_v30  ;;  %v618_v43 = vrot.slane %v1387_v33, %v1772_v30  ;;  %v1383_v33 = vld.sshfl [vmem:[%s1758_s27 + $0x4] sm:$0x33 pattern:$0x75316420] }
  0x22   : > { %v550_v44 = vunpack.i.h.s16 %v470_v34  ;;  %v594_v46 = vpack.i.b16 %v562_v36, %v562_v36  ;;  %v674_v48 = vrot.slane %v1394_v37, %v1772_v30  ;;  %v678_v49 = vrot.slane %v592_v38, %v1772_v30  ;;  %v1385_v38 = vld.sshfl [vmem:[%s1758_s27 + $0xc] sm:$0x33 pattern:$0x75316420]  ;;  %p1598_p4 = pnand %p1597_p3, %p1591_p0 }
  0x23   : > { %v622_v45 = vrot.slane %v578_v35, %v1772_v30  ;;  %v518_v50 = vcombine.high %v516_v27, %v516_v27  ;;  %v736_v51 = vpack.i.b16 %v610_v39, %v610_v39  ;;  %v682_v52 = vrot.slane %v1395_v40, %v1772_v30 }
  0x24   : > { %v1388_v53 = vpack.i.b16 %v469_v31, %v469_v31  ;;  %v580_v54 = vpack.i.b16 %v548_v41, %v548_v41  ;;  %v743_v55 = vpack.i.b16 %v614_v42, %v614_v42  ;;  %v750_v56 = vpack.i.b16 %v618_v43, %v618_v43 }
  0x25   : > { %v1389_v57 = vpack.i.b16 %v470_v34, %v470_v34  ;;  %v582_v58 = vpack.i.b16 %v550_v44, %v550_v44  ;;  %v757_v59 = vpack.i.b16 %v622_v45, %v622_v45  ;;  %v686_v60 = vrot.slane %v594_v46, %v1772_v30 }
  0x26   : > { %1514 = vmatmul.mubr.msk.bf16.gmra.mrb[4].mxu0 %vm317_vm0, %v1586_v10  ;;  %1522 = vmatmul.mubr.msk.bf16.gmra.mrb[4].mxu1 %vm317_vm0, %v1587_v11  ;;  %v564_v61 = vunpack.i.h.s16 %v517_v47  ;;  %v848_v62 = vpack.i.b16 %v674_v48, %v674_v48  ;;  %v855_v63 = vpack.i.b16 %v678_v49, %v678_v49  ;;  %v566_v0 = vunpack.i.h.s16 %v518_v50 }
  0x27   : > { %v741_v1 = vrot.slane %v736_v51, %v1772_v30  ;;  %v862_v2 = vpack.i.b16 %v682_v52, %v682_v52  ;;  %v626_v3 = vrot.slane %v1388_v53, %v1772_v30  ;;  %v630_v4 = vrot.slane %v580_v54, %v1772_v30 }
  0x28   : > { %v748_v5 = vrot.slane %v743_v55, %v1772_v30  ;;  %v755_v6 = vrot.slane %v750_v56, %v1772_v30  ;;  %v634_v7 = vrot.slane %v1389_v57, %v1772_v30  ;;  %v638_v8 = vrot.slane %v582_v58, %v1772_v30 }
  0x29   : > { %v762_v9 = vrot.slane %v757_v59, %v1772_v30  ;;  %v1653_v10 = vmov 1983009808   ;;  %v1396_v12 = vpack.i.b16 %v517_v47, %v517_v47  ;;  %v596_v13 = vpack.i.b16 %v564_v61, %v564_v61 }
  0x2a   : > { %v1026_v11 = vunpack.c.l.s4 %v1653_v10  ;;  %v853_v14 = vrot.slane %v848_v62, %v1772_v30  ;;  %v860_v15 = vrot.slane %v855_v63, %v1772_v30  ;;  %v1397_v17 = vpack.i.b16 %v518_v50, %v518_v50 }
  0x2b   : > { %v598_v19 = vpack.i.b16 %v566_v0, %v566_v0  ;;  %v867_v20 = vrot.slane %v862_v2, %v1772_v30  ;;  %v869_v21 = vpack.i.b16 %v686_v60, %v686_v60  ;;  %v764_v22 = vpack.i.b16 %v626_v3, %v626_v3 }
  0x2c   : > { %v771_v23 = vpack.i.b16 %v630_v4, %v630_v4  ;;  %v959_v24 = vunpack.c.l.bf16 %v741_v1  ;;  %v960_v25 = vunpack.c.l.bf16 %v748_v5  ;;  %v778_v26 = vpack.i.b16 %v634_v7, %v634_v7 }
  0x2d   : > { %v785_v27 = vpack.i.b16 %v638_v8, %v638_v8  ;;  %v961_v28 = vunpack.c.l.bf16 %v755_v6  ;;  %v962_v29 = vunpack.c.l.bf16 %v762_v9  ;;  %v690_v31 = vrot.slane %v1396_v12, %v1772_v30 }
  0x2e   : > { %v694_v32 = vrot.slane %v596_v13, %v1772_v30  ;;  %v1027_v34 = vunpack.c.0.s8 %v1026_v11  ;;  %v975_v35 = vunpack.c.l.bf16 %v853_v14  ;;  %v698_v36 = vrot.slane %v1397_v17, %v1772_v30 }
  0x2f   : > { %v702_v37 = vrot.slane %v598_v19, %v1772_v30  ;;  %v874_v39 = vrot.slane %v869_v21, %v1772_v30  ;;  %v976_v40 = vunpack.c.l.bf16 %v860_v15  ;;  %v769_v41 = vrot.slane %v764_v22, %v1772_v30 }
  0x30   : > { %v776_v42 = vrot.slane %v771_v23, %v1772_v30  ;;  %v1802_v43 = vcombine.low %v959_v24, %v960_v25  ;;  %v783_v44 = vrot.slane %v778_v26, %v1772_v30  ;;  %v790_v45 = vrot.slane %v785_v27, %v1772_v30 }
  0x31   : > { %v478_v46 = vcombine.high %v1383_v33, %v1383_v33  ;;  %v1806_v47 = vcombine.low %v961_v28, %v962_v29  ;;  %v876_v48 = vpack.i.b16 %v690_v31, %v690_v31  ;;  %v883_v49 = vpack.i.b16 %v694_v32, %v694_v32 }
  0x32   : > { %v526_v50 = vcombine.high %v1385_v38, %v1385_v38  ;;  %v977_v51 = vunpack.c.l.bf16 %v867_v20  ;;  %v890_v52 = vpack.i.b16 %v698_v36, %v698_v36  ;;  %v897_v53 = vpack.i.b16 %v702_v37, %v702_v37 }
  0x33   : > { %v485_v54 = vrot.slane %v1383_v33, %v1764_v18  ;;  %v1810_v55 = vsub.s32 %v1027_v34, %v1760_v16  ;;  %v978_v56 = vunpack.c.l.bf16 %v874_v39  ;;  %v963_v57 = vunpack.c.l.bf16 %v769_v41 }
  0x34   : > { %v964_v58 = vunpack.c.l.bf16 %v776_v42  ;;  %v965_v59 = vunpack.c.l.bf16 %v783_v44  ;;  %v966_v60 = vunpack.c.l.bf16 %v790_v45  ;;  %v492_v61 = vrot.slane %v478_v46, %v1764_v18 }
  0x35   : > { %v881_v62 = vrot.slane %v876_v48, %v1772_v30  ;;  %v888_v63 = vrot.slane %v883_v49, %v1772_v30  ;;  %v533_v0 = vrot.slane %v1385_v38, %v1764_v18  ;;  %v540_v1 = vrot.slane %v526_v50, %v1764_v18 }
  0x36   : > { %v1817_v2 = vcombine.low %v975_v35, %v976_v40  ;;  %v895_v16 = vrot.slane %v890_v52, %v1772_v30  ;;  %v902_v3 = vrot.slane %v897_v53, %v1772_v30  ;;  %v552_v4 = vunpack.i.h.s16 %v485_v54 }
  0x37   : > { %v1031_v5 = vrot.slane %v1802_v43, %v1810_v55  ;;  %v1038_v6 = vrot.slane %v1806_v47, %v1810_v55  ;;  %v1825_v7 = vcombine.low %v977_v51, %v978_v56  ;;  %v1827_v8 = vcombine.low %v963_v57, %v964_v58 }
  0x38   : > { %v1829_v9 = vcombine.low %v965_v59, %v966_v60  ;;  %v1390_v18 = vpack.i.b16 %v485_v54, %v485_v54  ;;  %v493_v10 = vcombine.high %v485_v54, %v485_v54  ;;  %v494_v11 = vcombine.high %v492_v61, %v492_v61 }
  0x39   : > { %v979_v12 = vunpack.c.l.bf16 %v881_v62  ;;  %v980_v13 = vunpack.c.l.bf16 %v888_v63  ;;  %v541_v14 = vcombine.high %v533_v0, %v533_v0  ;;  %v542_v15 = vcombine.high %v540_v1, %v540_v1 }
  0x3a   : > { %v981_v17 = vunpack.c.l.bf16 %v895_v16  ;;  %v982_v19 = vunpack.c.l.bf16 %v902_v3  ;;  %v554_v20 = vunpack.i.h.s16 %v492_v61  ;;  %v584_v21 = vpack.i.b16 %v552_v4, %v552_v4 }
  0x3b   : > { %v1099_v22 = vrot.slane %v1817_v2, %v1810_v55  ;;  %v1106_v23 = vrot.slane %v1825_v7, %v1810_v55  ;;  %v568_v24 = vunpack.i.h.s16 %v533_v0  ;;  %v570_v25 = vunpack.i.h.s16 %v540_v1 }
  0x3c   : > { %v1048_v26 = vrot.slane %v1827_v8, %v1810_v55  ;;  %v1055_v27 = vrot.slane %v1829_v9, %v1810_v55  ;;  %v556_v28 = vunpack.i.h.s16 %v493_v10  ;;  %v558_v29 = vunpack.i.h.s16 %v494_v11 }
  0x3d   : > { %v1839_v31 = vcombine.low %v979_v12, %v980_v13  ;;  %v1391_v32 = vpack.i.b16 %v492_v61, %v492_v61  ;;  %v572_v33 = vunpack.i.h.s16 %v541_v14  ;;  %v574_v34 = vunpack.i.h.s16 %v542_v15 }
  0x3e   : > { %v1841_v35 = vcombine.low %v981_v17, %v982_v19  ;;  %v586_v36 = vpack.i.b16 %v554_v20, %v554_v20  ;;  %v642_v37 = vrot.slane %v1390_v18, %v1772_v30  ;;  %v646_v38 = vrot.slane %v584_v21, %v1772_v30 }
  0x3f   : > { %v1398_v39 = vpack.i.b16 %v533_v0, %v533_v0  ;;  %v600_v40 = vpack.i.b16 %v568_v24, %v568_v24  ;;  %v1399_v41 = vpack.i.b16 %v540_v1, %v540_v1  ;;  %v602_v42 = vpack.i.b16 %v570_v25, %v570_v25 }
  0x40   : > { %v1392_v44 = vpack.i.b16 %v493_v10, %v493_v10  ;;  %v588_v45 = vpack.i.b16 %v556_v28, %v556_v28  ;;  %v1393_v46 = vpack.i.b16 %v494_v11, %v494_v11  ;;  %v590_v48 = vpack.i.b16 %v558_v29, %v558_v29 }
  0x41   : > { %v1400_v49 = vpack.i.b16 %v541_v14, %v541_v14  ;;  %v604_v50 = vpack.i.b16 %v572_v33, %v572_v33  ;;  %v1401_v51 = vpack.i.b16 %v542_v15, %v542_v15  ;;  %v606_v52 = vpack.i.b16 %v574_v34, %v574_v34 }
  0x42   : > { %v1116_v53 = vrot.slane %v1839_v31, %v1810_v55  ;;  %v650_v54 = vrot.slane %v1391_v32, %v1772_v30  ;;  %v654_v56 = vrot.slane %v586_v36, %v1772_v30  ;;  %v792_v57 = vpack.i.b16 %v642_v37, %v642_v37 }
  0x43   : > { %v706_v58 = vrot.slane %v1398_v39, %v1772_v30  ;;  %v710_v59 = vrot.slane %v600_v40, %v1772_v30  ;;  %v714_v60 = vrot.slane %v1399_v41, %v1772_v30  ;;  %v718_v61 = vrot.slane %v602_v42, %v1772_v30 }
  0x44   : > { %v658_v62 = vrot.slane %v1392_v44, %v1772_v30  ;;  %v662_v63 = vrot.slane %v588_v45, %v1772_v30  ;;  %v666_v0 = vrot.slane %v1393_v46, %v1772_v30  ;;  %v670_v1 = vrot.slane %v590_v48, %v1772_v30 }
  0x45   : > { %v722_v16 = vrot.slane %v1400_v49, %v1772_v30  ;;  %v726_v3 = vrot.slane %v604_v50, %v1772_v30  ;;  %v730_v4 = vrot.slane %v1401_v51, %v1772_v30  ;;  %v734_v18 = vrot.slane %v606_v52, %v1772_v30 }
  0x46   : > { %v1123_v10 = vrot.slane %v1841_v35, %v1810_v55  ;;  %v799_v11 = vpack.i.b16 %v646_v38, %v646_v38  ;;  %v806_v12 = vpack.i.b16 %v650_v54, %v650_v54  ;;  %v813_v13 = vpack.i.b16 %v654_v56, %v654_v56 }
  0x47   : > { %v904_v14 = vpack.i.b16 %v706_v58, %v706_v58  ;;  %v911_v15 = vpack.i.b16 %v710_v59, %v710_v59  ;;  %v918_v17 = vpack.i.b16 %v714_v60, %v714_v60  ;;  %v925_v19 = vpack.i.b16 %v718_v61, %v718_v61 }
  0x48   : > { %v820_v20 = vpack.i.b16 %v658_v62, %v658_v62  ;;  %v827_v21 = vpack.i.b16 %v662_v63, %v662_v63  ;;  %v834_v24 = vpack.i.b16 %v666_v0, %v666_v0  ;;  %v841_v25 = vpack.i.b16 %v670_v1, %v670_v1 }
  0x49   : > { %v932_v28 = vpack.i.b16 %v722_v16, %v722_v16  ;;  %v939_v29 = vpack.i.b16 %v726_v3, %v726_v3  ;;  %v946_v32 = vpack.i.b16 %v730_v4, %v730_v4  ;;  %v953_v33 = vpack.i.b16 %v734_v18, %v734_v18 }
  0x4a   : > { %v797_v34 = vrot.slane %v792_v57, %v1772_v30  ;;  %v804_v36 = vrot.slane %v799_v11, %v1772_v30  ;;  %v811_v35 = vrot.slane %v806_v12, %v1772_v30  ;;  %v818_v37 = vrot.slane %v813_v13, %v1772_v30 }
  0x4b   : > { %v909_v38 = vrot.slane %v904_v14, %v1772_v30  ;;  %v916_v39 = vrot.slane %v911_v15, %v1772_v30  ;;  %v923_v40 = vrot.slane %v918_v17, %v1772_v30  ;;  %v930_v41 = vrot.slane %v925_v19, %v1772_v30 }
  0x4c   : > { %v825_v42 = vrot.slane %v820_v20, %v1772_v30  ;;  %v832_v44 = vrot.slane %v827_v21, %v1772_v30  ;;  %v839_v45 = vrot.slane %v834_v24, %v1772_v30  ;;  %v846_v46 = vrot.slane %v841_v25, %v1772_v30 }
  0x4d   : > { %v937_v48 = vrot.slane %v932_v28, %v1772_v30  ;;  %v944_v49 = vrot.slane %v939_v29, %v1772_v30  ;;  %v951_v50 = vrot.slane %v946_v32, %v1772_v30  ;;  %v958_v51 = vrot.slane %v953_v33, %v1772_v30  ;;  %v1882_v30 = vld [vmem:[%s1997_s3] ss:$0 sm:$0xff] }
  0x4e   : > { %v967_v52 = vunpack.c.l.bf16 %v797_v34  ;;  %v968_v54 = vunpack.c.l.bf16 %v804_v36  ;;  %v969_v56 = vunpack.c.l.bf16 %v811_v35  ;;  %v970_v57 = vunpack.c.l.bf16 %v818_v37 }
  0x4f   : > { %v983_v58 = vunpack.c.l.bf16 %v909_v38  ;;  %v984_v59 = vunpack.c.l.bf16 %v916_v39  ;;  %v985_v60 = vunpack.c.l.bf16 %v923_v40  ;;  %v986_v61 = vunpack.c.l.bf16 %v930_v41 }
  0x50   : > { %v971_v62 = vunpack.c.l.bf16 %v825_v42  ;;  %v972_v63 = vunpack.c.l.bf16 %v832_v44  ;;  %v973_v0 = vunpack.c.l.bf16 %v839_v45  ;;  %v974_v1 = vunpack.c.l.bf16 %v846_v46 }
  0x51   : > { %v987_v16 = vunpack.c.l.bf16 %v937_v48  ;;  %v988_v3 = vunpack.c.l.bf16 %v944_v49  ;;  %v989_v4 = vunpack.c.l.bf16 %v951_v50  ;;  %v990_v18 = vunpack.c.l.bf16 %v958_v51 }
  0x52   : > { %v1057_v11 = vcombine.low %v967_v52, %v968_v54  ;;  %v1058_v12 = vcombine.low %v969_v56, %v970_v57  ;;  %v1125_v13 = vcombine.low %v983_v58, %v984_v59  ;;  %v1126_v14 = vcombine.low %v985_v60, %v986_v61 }
  0x53   : > { %v1039_v15 = vcombine.low %v1031_v5, %v1038_v6  ;;  %v1107_v17 = vcombine.low %v1099_v22, %v1106_v23  ;;  %v1074_v19 = vcombine.low %v971_v62, %v972_v63  ;;  %v1075_v20 = vcombine.low %v973_v0, %v974_v1 }
  0x54   : > { %v1056_v43 = vcombine.low %v1048_v26, %v1055_v27  ;;  %v1124_v47 = vcombine.low %v1116_v53, %v1123_v10  ;;  %v1142_v5 = vcombine.low %v987_v16, %v988_v3  ;;  %v1143_v2 = vcombine.low %v989_v4, %v990_v18 }
  0x55   : > { %v1065_v25 = vrot.slane %v1057_v11, %v1810_v55  ;;  %v1072_v9 = vrot.slane %v1058_v12, %v1810_v55  ;;  %v1133_v53 = vrot.slane %v1125_v13, %v1810_v55  ;;  %v1140_v10 = vrot.slane %v1126_v14, %v1810_v55 }
  0x56   : > { %v1082_v34 = vrot.slane %v1074_v19, %v1810_v55  ;;  %v1089_v36 = vrot.slane %v1075_v20, %v1810_v55  ;;  %v1150_v38 = vrot.slane %v1142_v5, %v1810_v55  ;;  %v1157_v39 = vrot.slane %v1143_v2, %v1810_v55 }
  0x57   : > { %v1073_v57 = vcombine.low %v1065_v25, %v1072_v9  ;;  %v1141_v59 = vcombine.low %v1133_v53, %v1140_v10 }
  0x58   : > { %v1090_v63 = vcombine.low %v1082_v34, %v1089_v36  ;;  %v1158_v0 = vcombine.low %v1150_v38, %v1157_v39 }
  0xf1   : > { %v1511_v21 = vpop.f32.mrb[0].mxu0  ;;  %v1519_v24 = vpop.f32.mrb[0].mxu1 }
  0xf2   : > { %v385_v6 = vadd.f32 %v1511_v21, %v1882_v30  ;;  %v417_v7 = vadd.f32 %v1519_v24, %v1882_v30  ;;  %v376_v22 = vpop.f32.mrb[1].mxu0  ;;  %v408_v23 = vpop.f32.mrb[1].mxu1 }
  0xf3   : > { %v377_v8 = vadd.f32 %v1882_v30, %v376_v22  ;;  %v409_v26 = vadd.f32 %v1882_v30, %v408_v23  ;;  %v1512_v27 = vpop.f32.mrb[2].mxu0  ;;  %v1520_v31 = vpop.f32.mrb[2].mxu1 }
  0xf4   : > { %v388_v28 = vadd.f32 %v1512_v27, %v1882_v30  ;;  %v420_v29 = vadd.f32 %v1520_v31, %v1882_v30  ;;  %v379_v32 = vpop.f32.mrb[3].mxu0  ;;  %v411_v33 = vpop.f32.mrb[3].mxu1  ;;  %v1169_v40 = vadd.f32 %v1039_v15, %v385_v6  ;;  %v1177_v41 = vadd.f32 %v1107_v17, %v417_v7 }
  0xf5   : > { %v380_v35 = vadd.f32 %v1882_v30, %v379_v32  ;;  %v412_v37 = vadd.f32 %v1882_v30, %v411_v33  ;;  %v1167_v45 = vadd.f32 %v1039_v15, %v377_v8  ;;  %v1175_v46 = vadd.f32 %v1107_v17, %v409_v26 }
  0xf6   : > { %v1170_v42 = vadd.f32 %v1056_v43, %v388_v28  ;;  %v1178_v44 = vadd.f32 %v1124_v47, %v420_v29 }
  0xf7   : > { %v1168_v48 = vadd.f32 %v1056_v43, %v380_v35  ;;  %v1176_v49 = vadd.f32 %v1124_v47, %v412_v37 }
  0xf8   : > { %v1450_v50 = vpack.c.bf16 %v1170_v42, %v1169_v40  ;;  %v1470_v51 = vpack.c.bf16 %v1178_v44, %v1177_v41 }
  0xf9   : > { %v1445_v52 = vpack.c.bf16 %v1168_v48, %v1167_v45  ;;  %v1465_v54 = vpack.c.bf16 %v1176_v49, %v1175_v46  ;;  %v1515_v56 = vpop.f32.mrb[4].mxu0  ;;  %v1523_v58 = vpop.f32.mrb[4].mxu1 }
  0xfa   : > { %1482 = vst [vmem:[%s1924_s6 + $0x8] sm:$0xff] %v1450_v50   ;;  %1486 = vst [vmem:[%s1924_s6 + $0x28] sm:$0xff] %v1470_v51   ;;  %v401_v55 = vadd.f32 %v1515_v56, %v1882_v30  ;;  %v433_v60 = vadd.f32 %v1523_v58, %v1882_v30  ;;  %v392_v61 = vpop.f32.mrb[5].mxu0  ;;  %v424_v62 = vpop.f32.mrb[5].mxu1 }
  0xfb   : > { %1446 = vst [vmem:[%s1924_s6] sm:$0xff] %v1445_v52   ;;  %1485 = vst [vmem:[%s1924_s6 + $0x20] sm:$0xff] %v1465_v54   ;;  %v393_v1 = vadd.f32 %v1882_v30, %v392_v61  ;;  %v425_v16 = vadd.f32 %v1882_v30, %v424_v62  ;;  %v1516_v3 = vpop.f32.mrb[6].mxu0  ;;  %v1524_v4 = vpop.f32.mrb[6].mxu1 }
  0xfc   : > { %v404_v18 = vadd.f32 %v1516_v3, %v1882_v30  ;;  %v436_v11 = vadd.f32 %v1524_v4, %v1882_v30  ;;  %v395_v12 = vpop.f32.mrb[7].mxu0  ;;  %v427_v13 = vpop.f32.mrb[7].mxu1  ;;  %v1173_v17 = vadd.f32 %v1073_v57, %v401_v55  ;;  %v1181_v19 = vadd.f32 %v1141_v59, %v433_v60 }
  0xfd   : > { %v396_v14 = vadd.f32 %v1882_v30, %v395_v12  ;;  %v428_v15 = vadd.f32 %v1882_v30, %v427_v13  ;;  %v1171_v24 = vadd.f32 %v1073_v57, %v393_v1  ;;  %v1179_v43 = vadd.f32 %v1141_v59, %v425_v16 }
  0xfe   : > { %v1174_v20 = vadd.f32 %v1090_v63, %v404_v18  ;;  %v1182_v21 = vadd.f32 %v1158_v0, %v436_v11 }
  0xff   : > { %v1172_v47 = vadd.f32 %v1090_v63, %v396_v14  ;;  %v1180_v5 = vadd.f32 %v1158_v0, %v428_v15 }
 0x100   : > { %v1460_v2 = vpack.c.bf16 %v1174_v20, %v1173_v17  ;;  %v1480_v6 = vpack.c.bf16 %v1182_v21, %v1181_v19 }
 0x101   : > { %v1455_v30 = vpack.c.bf16 %v1172_v47, %v1171_v24  ;;  %v1475_v7 = vpack.c.bf16 %v1180_v5, %v1179_v43 }
 0x102   : > { %1484 = vst [vmem:[%s1924_s6 + $0x18] sm:$0xff] %v1460_v2   ;;  %1488 = vst [vmem:[%s1924_s6 + $0x38] sm:$0xff] %v1480_v6  }
 0x103   : > { %1483 = vst [vmem:[%s1924_s6 + $0x10] sm:$0xff] %v1455_v30   ;;  %1487 = vst [vmem:[%s1924_s6 + $0x30] sm:$0xff] %v1475_v7  }
 0x104   : > { %1601 = shalt.err (!%p1598_p4)
}
 0x105   : > { %s1602_s22 = scalar_lea.hbm %s1943_s19, 1024  ;;  %s1606_s28 = scalar_lea.hbm %s1998_s4, 4096 }
 0x106   : > { %p1603_p7 = scmp.ne.s32.totalorder %s1943_s19, %s1602_s22  ;;  %p1607_p10 = scmp.lt.u32.totalorder %s1943_s19, %s1998_s4 }
 0x107   : > { %p1608_p11 = scmp.lt.u32.totalorder %s1606_s28, %s1602_s22  ;;  %p1610_p13 = scmp.lt.u32.totalorder %s1602_s22, %s1943_s19 }
 0x108   : > { %p1604_p8 = pnand %p1603_p7, %p1720_p5 }
 0x109   : > { %p1609_p12 = por %p1608_p11, %p1607_p10 }
 0x10a   : > { %p1605_p9 = pneg %p1604_p8 }
 0x10b   : > { %p1611_p0 = por %p1610_p13, %p1609_p12 }
 0x10d   : > { %p1612_p1 = pnand %p1611_p0, %p1605_p9 }
 0x10f   : > { %1615 = shalt.err (!%p1612_p1)
}
 0x110   : > { %s1655_s5 = smov 64   ;;  %s1656_s6 = smov 4  }
 0x111   : > { %1533 = dma.vmem_to_hbm [thread:$0]  (%p1720_p5), %s1945_s8, 1024, %s1943_s19, %s1953_s11, %s1655_s5, %s1655_s5, %s1656_s6  }
 0x112 PF: > { %p1539_p2 = scmp.ge.s32.totalorder %s1650_s18, 2  ;;  %s1293_s7 = sand.u32 1, %s1638_s15  }
 0x113   : > { %s1294_s9 = scalar_lea.sflag [#allocation3], %s1293_s7 }
 0x114   : > { %p1536_p3 = pnand %p1539_p2, %p1724_p6 }
 0x116   : > { %1633 = dma.done.wait (!%p1536_p3), %s1294_s9, 1024  }
 0x117   : > { %1635 = vsyncadd (!%p1536_p3), %s1294_s9, 4294966272  ;;  %p14_p4 = scmp.ge.s32.totalorder %s1707_s21, 6   ;;  %s2001_s15 = smov %s1642_s16 }
 0x118   : > { %s2002_s16 = smov %s1646_s17  ;;  %s2003_s17 = smov %s1718_s24 }
 0x119   : > { %s2004_s18 = smov %s1707_s21  ;;  %16 = sbr.rel (!%p14_p4) target bundleno = 3 (0x3), region = 74 }
 0x120   :  { %1299 = vsyncpa [#allocation3], 1 }
 0x121   :  { %1301 = vsyncpa [#allocation3 + $0x1], 1 }

</bundles_post_ra>
